<compile_context>
chip_gen: v6e
topology: v6e:2x2x1
jax: 0.10.0
libtpu: 0.0.40
codegen_flags: <defaults>
</compile_context>

<pallas_src>
import jax
import jax.numpy as jnp
from jax.experimental import pallas as pl
from jax.experimental.pallas import tpu as pltpu


def _round_up(v, m):
    return ((v + m - 1) // m) * m


def student_encoder_kernel(x_ref, w1_ref, b1_ref, w2_ref, b2_ref,
                           a_ref, bm_ref, cst_ref, rho_ref, out_ref):
    # ---- encoder.encode(x): (flattened) linear -> relu -> linear ----
    # x arrives as f32 (single HBM stream); cast to bf16 here for the MXU.
    xb = x_ref[...].astype(jnp.bfloat16)
    h = jnp.dot(xb, w1_ref[...], preferred_element_type=jnp.float32)
    h = jnp.maximum(h + b1_ref[...], 0.0)                        # (TB, HP) f32, lane-dense
    e = jnp.dot(h.astype(jnp.bfloat16), w2_ref[...],
                preferred_element_type=jnp.float32) + b2_ref[...]  # (TB, n_in) f32

    # ---- FuzzyLayer (type-1, Gaussian memberships, product t-norm) ----
    # d[b,m] = sum_i (e-c)^2/(2 s^2)  ==  (e*e)@A + e@Bm + cst
    # (two accumulated small-K matmuls; no lane-axis concat).
    d = (jnp.dot(e * e, a_ref[...], preferred_element_type=jnp.float32)
         + jnp.dot(e, bm_ref[...], preferred_element_type=jnp.float32)
         + cst_ref[...])
    # fn is exactly softmax(-d): subtracting the row-wise min is mathematically
    # a no-op but prevents exp underflow (all-zero firing rows).
    d = d - jnp.min(d, axis=-1, keepdims=True)
    f = jnp.exp(-d)                                              # (TB, MP); padded cols -> 0
    # Defuzzification with the normalizer folded in: rho_aug[:, 0] is ones,
    # rho_aug[:, 1:1+n_out] is rho (padded membership rows are zero).
    g = jnp.dot(f, rho_ref[...], preferred_element_type=jnp.float32)  # (TB, NOP)
    inv = pl.reciprocal(g[:, 0:1] + 1e-12, approx=True)          # EUP slot, ~free
    out_ref[...] = g * inv                                       # lane-dense store


def make_student_encoder(params, *, tb_max=1024):
    """One-time parameter preparation; returns a jitted forward(x_nchw)."""
    w1 = params["w1"].astype(jnp.float32)
    w2 = params["w2"].astype(jnp.float32)
    b1 = params["b1"].astype(jnp.float32)
    b2 = params["b2"].astype(jnp.float32)
    centers = params["centers"].astype(jnp.float32)
    sigmas = params["sigmas"].astype(jnp.float32)
    rho = params["rho"].astype(jnp.float32)

    D, hidden = w1.shape
    M, n_in = centers.shape
    n_out = rho.shape[1]
    HP = _round_up(hidden, 128)                    # lane-pad hidden activations
    MP = _round_up(M, 128)                         # lane-pad memberships
    NOP = _round_up(n_out + 1, 128)                # lane-pad outputs (+1 sum col)

    # Zero-pad the hidden dim: padded h columns are exactly 0 after ReLU and
    # the matching w2 rows are 0, so the encoder output is unchanged.
    w1p = jnp.pad(w1, ((0, 0), (0, HP - hidden))).astype(jnp.bfloat16)   # (D, HP)
    b1p = jnp.pad(b1, ((0, 0), (0, HP - hidden)))                        # (1, HP)
    w2p = jnp.pad(w2, ((0, HP - hidden), (0, 0))).astype(jnp.bfloat16)   # (HP, n_in)

    # Parameter-derived constants (pure algebra on weights, hoisted out of
    # the per-call path).
    inv2s2 = 1.0 / (2.0 * sigmas * sigmas)                       # (M, n_in)
    a_mat = jnp.pad(inv2s2.T, ((0, 0), (0, MP - M)))             # (n_in, MP)
    bm_mat = jnp.pad((-centers / (sigmas * sigmas)).T,
                     ((0, 0), (0, MP - M)))                      # (n_in, MP)
    cst = jnp.sum(centers * centers * inv2s2, axis=-1)[None, :]  # (1, M)
    # Pads get a huge (finite!) constant -> firing exactly 0 after exp; do not
    # use inf here (d - min(d) would produce NaN on padded lanes).
    cst = jnp.pad(cst, ((0, 0), (0, MP - M)), constant_values=1e30)
    rho_aug = jnp.concatenate([jnp.ones((M, 1), jnp.float32), rho], axis=1)
    rho_aug = jnp.pad(rho_aug, ((0, MP - M), (0, NOP - (n_out + 1))))  # (MP, NOP)

    @jax.jit
    def forward(x_nchw):
        B = x_nchw.shape[0]
        x = x_nchw.reshape(B, -1)                  # stays f32; bf16 cast in-kernel
        assert x.shape[1] == D
        # Batch tile: multiple of 8 (f32 sublanes), as large as tb_max allows.
        TB = min(tb_max, _round_up(B, 8))
        # Keep >= 2 batch tiles when there is enough work so the "parallel"
        # axis can be split across both TensorCores on v7x.
        if B >= 512:
            TB = min(TB, _round_up((B + 1) // 2, 8))
        B_pad = _round_up(B, TB)
        if B_pad != B:
            x = jnp.pad(x, ((0, B_pad - B), (0, 0)))
        nb = B_pad // TB

        out = pl.pallas_call(
            student_encoder_kernel,
            out_shape=jax.ShapeDtypeStruct((B_pad, NOP), jnp.float32),
            grid=(nb,),
            in_specs=[
                pl.BlockSpec((TB, D), lambda i: (i, 0)),          # x: streamed (f32)
                pl.BlockSpec((D, HP), lambda i: (0, 0)),          # weights: resident
                pl.BlockSpec((1, HP), lambda i: (0, 0)),
                pl.BlockSpec((HP, n_in), lambda i: (0, 0)),
                pl.BlockSpec((1, n_in), lambda i: (0, 0)),
                pl.BlockSpec((n_in, MP), lambda i: (0, 0)),
                pl.BlockSpec((n_in, MP), lambda i: (0, 0)),
                pl.BlockSpec((1, MP), lambda i: (0, 0)),
                pl.BlockSpec((MP, NOP), lambda i: (0, 0)),
            ],
            out_specs=pl.BlockSpec((TB, NOP), lambda i: (i, 0)),
            compiler_params=pltpu.CompilerParams(
                dimension_semantics=("parallel",),                # megacore on v7x
                vmem_limit_bytes=64 * 1024 * 1024),               # clears v5e 16 MiB default
        )(x, w1p, b1p, w2p, b2, a_mat, bm_mat, cst, rho_aug)
        # Slice fuses inside this jit; column 0 is the (normalized-away) sum.
        return out[:B, 1:1 + n_out]

    return forward


def reference_forward(x_nchw, params):
    # Pure-JAX reference; mirrors the kernel's bf16 encoder-matmul precision so
    # the comparison isolates the fuzzy-layer math.
    B = x_nchw.shape[0]
    x = x_nchw.reshape(B, -1).astype(jnp.bfloat16)
    w1 = params["w1"].astype(jnp.bfloat16)
    w2 = params["w2"].astype(jnp.bfloat16)
    h = jnp.maximum(jnp.dot(x, w1, preferred_element_type=jnp.float32)
                    + params["b1"], 0.0)
    e = (jnp.dot(h.astype(jnp.bfloat16), w2, preferred_element_type=jnp.float32)
         + params["b2"])
    c, s = params["centers"], params["sigmas"]
    mu = jnp.exp(-((e[:, None, :] - c[None]) ** 2) / (2.0 * s[None] ** 2))
    f = jnp.prod(mu, axis=-1)
    fn = f / (jnp.sum(f, axis=-1, keepdims=True) + 1e-12)
    return fn @ params["rho"]


if __name__ == "__main__":
    # Small, module-consistent sizes.
    B, C, H, W = 2, 4, 16, 16
    D = C * H * W
    hidden = 32
    n_inputs = 8          # encoder output dim == fuzzy layer n_inputs
    n_memberships = 6
    n_outputs = 5

    key = jax.random.PRNGKey(0)
    k = jax.random.split(key, 8)
    x = jax.random.normal(k[0], (B, C, H, W), dtype=jnp.float32)

    params = {
        "w1": jax.random.normal(k[1], (D, hidden), dtype=jnp.float32) * 0.05,
        "b1": jnp.zeros((1, hidden), dtype=jnp.float32),
        "w2": jax.random.normal(k[2], (hidden, n_inputs), dtype=jnp.float32) * 0.1,
        "b2": jnp.zeros((1, n_inputs), dtype=jnp.float32),
        # Gaussian membership params (centers, sigmas>0) and rule outputs rho.
        "centers": jax.random.normal(k[3], (n_memberships, n_inputs),
                                     dtype=jnp.float32),
        "sigmas": jnp.abs(jax.random.normal(k[4], (n_memberships, n_inputs),
                                            dtype=jnp.float32)) + 0.5,
        "rho": jax.random.normal(k[5], (n_memberships, n_outputs),
                                 dtype=jnp.float32),
    }
    # TODO(synk): the original encoder is injected at construction time; a
    # 2-layer MLP encoder is synthesized here with deterministic weights.

    forward = make_student_encoder(params)
    out = jax.block_until_ready(forward(x))
    ref = reference_forward(x, params)

    assert out.shape == (B, n_outputs)
    # bf16 encoder matmuls (mirrored in the reference) + approx reciprocal in
    # the normalization -> modest tolerance.
    assert jnp.allclose(out, ref, atol=5e-3, rtol=5e-3), (out, ref)
    print("KERNEL_OK")
</pallas_src>

<mosaic_0001>
module attributes {stable_mosaic.version = 11 : i64} {
  func.func @student_encoder_kernel(%arg0: i32, %arg1: memref<8x1024xf32, #tpu.memory_space<vmem>>, %arg2: memref<1024x128xbf16, #tpu.memory_space<vmem>>, %arg3: memref<1x128xf32, #tpu.memory_space<vmem>>, %arg4: memref<128x8xbf16, #tpu.memory_space<vmem>>, %arg5: memref<1x8xf32, #tpu.memory_space<vmem>>, %arg6: memref<8x128xf32, #tpu.memory_space<vmem>>, %arg7: memref<8x128xf32, #tpu.memory_space<vmem>>, %arg8: memref<1x128xf32, #tpu.memory_space<vmem>>, %arg9: memref<128x128xf32, #tpu.memory_space<vmem>>, %arg10: memref<8x128xf32, #tpu.memory_space<vmem>>) attributes {dimension_semantics = [#tpu.dimension_semantics<parallel>], iteration_bounds = array<i64: 1>, scalar_prefetch = 0 : i64, scratch_operands = 0 : i64, tpu.core_type = #tpu.core_type<tc>, window_params = [{transform_indices = @transform_0, window_bounds = array<i64: 8, 1024>}, {pipeline_mode = #tpu.pipeline_mode<synchronous>, transform_indices = @transform_1, window_bounds = array<i64: 1024, 128>}, {pipeline_mode = #tpu.pipeline_mode<synchronous>, transform_indices = @transform_2, window_bounds = array<i64: 1, 128>}, {pipeline_mode = #tpu.pipeline_mode<synchronous>, transform_indices = @transform_3, window_bounds = array<i64: 128, 8>}, {pipeline_mode = #tpu.pipeline_mode<synchronous>, transform_indices = @transform_4, window_bounds = array<i64: 1, 8>}, {pipeline_mode = #tpu.pipeline_mode<synchronous>, transform_indices = @transform_5, window_bounds = array<i64: 8, 128>}, {pipeline_mode = #tpu.pipeline_mode<synchronous>, transform_indices = @transform_6, window_bounds = array<i64: 8, 128>}, {pipeline_mode = #tpu.pipeline_mode<synchronous>, transform_indices = @transform_7, window_bounds = array<i64: 1, 128>}, {pipeline_mode = #tpu.pipeline_mode<synchronous>, transform_indices = @transform_8, window_bounds = array<i64: 128, 128>}, {transform_indices = @transform_9, window_bounds = array<i64: 8, 128>}]} {
    %c0 = arith.constant 0 : index
    %c0_0 = arith.constant 0 : index
    %0 = vector.load %arg1[%c0, %c0_0] : memref<8x1024xf32, #tpu.memory_space<vmem>>, vector<8x1024xf32>
    %1 = arith.truncf %0 : vector<8x1024xf32> to vector<8x1024xbf16>
    %c0_1 = arith.constant 0 : index
    %c0_2 = arith.constant 0 : index
    %2 = vector.load %arg2[%c0_1, %c0_2] : memref<1024x128xbf16, #tpu.memory_space<vmem>>, vector<1024x128xbf16>
    %cst = arith.constant dense<0.000000e+00> : vector<8x128xf32>
    %3 = tpu.matmul %1, %2, %cst {dimension_numbers = #tpu.dot_dimension_numbers<[1], [0], [0], [1], [0, 0, 1, 1], [], []>} : vector<8x1024xbf16>, vector<1024x128xbf16>, vector<8x128xf32> -> vector<8x128xf32>
    %c0_3 = arith.constant 0 : index
    %c0_4 = arith.constant 0 : index
    %4 = vector.load %arg3[%c0_3, %c0_4] : memref<1x128xf32, #tpu.memory_space<vmem>>, vector<1x128xf32>
    %5 = vector.broadcast %4 : vector<1x128xf32> to vector<8x128xf32>
    %6 = arith.addf %3, %5 : vector<8x128xf32>
    %cst_5 = arith.constant 0.000000e+00 : f32
    %7 = vector.broadcast %cst_5 : f32 to vector<8x128xf32>
    %8 = arith.maximumf %6, %7 : vector<8x128xf32>
    %9 = arith.truncf %8 : vector<8x128xf32> to vector<8x128xbf16>
    %c0_6 = arith.constant 0 : index
    %c0_7 = arith.constant 0 : index
    %10 = vector.load %arg4[%c0_6, %c0_7] : memref<128x8xbf16, #tpu.memory_space<vmem>>, vector<128x8xbf16>
    %cst_8 = arith.constant dense<0.000000e+00> : vector<8x8xf32>
    %11 = tpu.matmul %9, %10, %cst_8 {dimension_numbers = #tpu.dot_dimension_numbers<[1], [0], [0], [1], [0, 0, 1, 1], [], []>} : vector<8x128xbf16>, vector<128x8xbf16>, vector<8x8xf32> -> vector<8x8xf32>
    %c0_9 = arith.constant 0 : index
    %c0_10 = arith.constant 0 : index
    %12 = vector.load %arg5[%c0_9, %c0_10] : memref<1x8xf32, #tpu.memory_space<vmem>>, vector<1x8xf32>
    %13 = vector.broadcast %12 : vector<1x8xf32> to vector<8x8xf32>
    %14 = arith.addf %11, %13 : vector<8x8xf32>
    %15 = arith.mulf %14, %14 : vector<8x8xf32>
    %c0_11 = arith.constant 0 : index
    %c0_12 = arith.constant 0 : index
    %16 = vector.load %arg6[%c0_11, %c0_12] : memref<8x128xf32, #tpu.memory_space<vmem>>, vector<8x128xf32>
    %cst_13 = arith.constant dense<0.000000e+00> : vector<8x128xf32>
    %17 = tpu.matmul %15, %16, %cst_13 {dimension_numbers = #tpu.dot_dimension_numbers<[1], [0], [0], [1], [0, 0, 1, 1], [], []>} : vector<8x8xf32>, vector<8x128xf32>, vector<8x128xf32> -> vector<8x128xf32>
    %c0_14 = arith.constant 0 : index
    %c0_15 = arith.constant 0 : index
    %18 = vector.load %arg7[%c0_14, %c0_15] : memref<8x128xf32, #tpu.memory_space<vmem>>, vector<8x128xf32>
    %cst_16 = arith.constant dense<0.000000e+00> : vector<8x128xf32>
    %19 = tpu.matmul %14, %18, %cst_16 {dimension_numbers = #tpu.dot_dimension_numbers<[1], [0], [0], [1], [0, 0, 1, 1], [], []>} : vector<8x8xf32>, vector<8x128xf32>, vector<8x128xf32> -> vector<8x128xf32>
    %20 = arith.addf %17, %19 : vector<8x128xf32>
    %c0_17 = arith.constant 0 : index
    %c0_18 = arith.constant 0 : index
    %21 = vector.load %arg8[%c0_17, %c0_18] : memref<1x128xf32, #tpu.memory_space<vmem>>, vector<1x128xf32>
    %22 = vector.broadcast %21 : vector<1x128xf32> to vector<8x128xf32>
    %23 = arith.addf %20, %22 : vector<8x128xf32>
    %cst_19 = arith.constant dense<0x7F800000> : vector<8xf32>
    %24 = vector.multi_reduction <minimumf>, %23, %cst_19 [1] : vector<8x128xf32> to vector<8xf32>
    %25 = vector.shape_cast %24 : vector<8xf32> to vector<8x1xf32>
    %26 = vector.broadcast %25 : vector<8x1xf32> to vector<8x128xf32>
    %27 = arith.subf %23, %26 : vector<8x128xf32>
    %cst_20 = arith.constant 0.000000e+00 : f32
    %28 = vector.broadcast %cst_20 : f32 to vector<8x128xf32>
    %29 = arith.subf %28, %27 : vector<8x128xf32>
    %30 = math.exp %29 : vector<8x128xf32>
    %c0_21 = arith.constant 0 : index
    %c0_22 = arith.constant 0 : index
    %31 = vector.load %arg9[%c0_21, %c0_22] : memref<128x128xf32, #tpu.memory_space<vmem>>, vector<128x128xf32>
    %cst_23 = arith.constant dense<0.000000e+00> : vector<8x128xf32>
    %32 = tpu.matmul %30, %31, %cst_23 {dimension_numbers = #tpu.dot_dimension_numbers<[1], [0], [0], [1], [0, 0, 1, 1], [], []>} : vector<8x128xf32>, vector<128x128xf32>, vector<8x128xf32> -> vector<8x128xf32>
    %33 = vector.extract_strided_slice %32 {offsets = [0, 0], sizes = [8, 1], strides = [1, 1]} : vector<8x128xf32> to vector<8x1xf32>
    %cst_24 = arith.constant 9.99999996E-13 : f32
    %34 = vector.broadcast %cst_24 : f32 to vector<8x1xf32>
    %35 = arith.addf %33, %34 : vector<8x1xf32>
    %36 = tpu.reciprocal %35 {approx = true} : vector<8x1xf32> -> vector<8x1xf32>
    %37 = vector.broadcast %36 : vector<8x1xf32> to vector<8x128xf32>
    %38 = arith.mulf %32, %37 : vector<8x128xf32>
    %c0_25 = arith.constant 0 : index
    %c0_26 = arith.constant 0 : index
    %39 = vector.load %arg10[%c0_25, %c0_26] : memref<8x128xf32, #tpu.memory_space<vmem>>, vector<8x128xf32>
    tpu.vector_store %arg10[%c0_25, %c0_26], %38 {strides = array<i32>} : memref<8x128xf32, #tpu.memory_space<vmem>>, vector<8x128xf32>,
    return
  }
  func.func @transform_0(%arg0: i32) -> (i32, i32) {
    %c0_i32 = arith.constant 0 : i32
    %c0_i32_0 = arith.constant 0 : i32
    return %arg0, %c0_i32 : i32, i32
  }
  func.func @transform_1(%arg0: i32) -> (i32, i32) {
    %c0_i32 = arith.constant 0 : i32
    %c0_i32_0 = arith.constant 0 : i32
    %c0_i32_1 = arith.constant 0 : i32
    return %c0_i32, %c0_i32_0 : i32, i32
  }
  func.func @transform_2(%arg0: i32) -> (i32, i32) {
    %c0_i32 = arith.constant 0 : i32
    %c0_i32_0 = arith.constant 0 : i32
    %c0_i32_1 = arith.constant 0 : i32
    return %c0_i32, %c0_i32_0 : i32, i32
  }
  func.func @transform_3(%arg0: i32) -> (i32, i32) {
    %c0_i32 = arith.constant 0 : i32
    %c0_i32_0 = arith.constant 0 : i32
    %c0_i32_1 = arith.constant 0 : i32
    return %c0_i32, %c0_i32_0 : i32, i32
  }
  func.func @transform_4(%arg0: i32) -> (i32, i32) {
    %c0_i32 = arith.constant 0 : i32
    %c0_i32_0 = arith.constant 0 : i32
    %c0_i32_1 = arith.constant 0 : i32
    return %c0_i32, %c0_i32_0 : i32, i32
  }
  func.func @transform_5(%arg0: i32) -> (i32, i32) {
    %c0_i32 = arith.constant 0 : i32
    %c0_i32_0 = arith.constant 0 : i32
    %c0_i32_1 = arith.constant 0 : i32
    return %c0_i32, %c0_i32_0 : i32, i32
  }
  func.func @transform_6(%arg0: i32) -> (i32, i32) {
    %c0_i32 = arith.constant 0 : i32
    %c0_i32_0 = arith.constant 0 : i32
    %c0_i32_1 = arith.constant 0 : i32
    return %c0_i32, %c0_i32_0 : i32, i32
  }
  func.func @transform_7(%arg0: i32) -> (i32, i32) {
    %c0_i32 = arith.constant 0 : i32
    %c0_i32_0 = arith.constant 0 : i32
    %c0_i32_1 = arith.constant 0 : i32
    return %c0_i32, %c0_i32_0 : i32, i32
  }
  func.func @transform_8(%arg0: i32) -> (i32, i32) {
    %c0_i32 = arith.constant 0 : i32
    %c0_i32_0 = arith.constant 0 : i32
    %c0_i32_1 = arith.constant 0 : i32
    return %c0_i32, %c0_i32_0 : i32, i32
  }
  func.func @transform_9(%arg0: i32) -> (i32, i32) {
    %c0_i32 = arith.constant 0 : i32
    %c0_i32_0 = arith.constant 0 : i32
    return %arg0, %c0_i32 : i32, i32
  }
}

</mosaic_0001>

<bundles_post_ra>
// kernel: forward.1
= control target key start
LH: loop header
LB: loop body
LE: loop exit
PB: predicated region body
PF: predicated region fallthrough
CT: control target
= control target key end

     0   :  { %14 = vsyncpa [#allocation3], 0  ;;  %s1484_s30 = smov [#allocation2]   ;;  %s1691_s0 = inlined_call_operand.vmem [shape: f32[8,1024], index: 0, kind: input, shape index: {}]   ;;  %s1692_s1 = inlined_call_operand.hbm [shape: bf16[1024,128], index: 1, kind: input, shape index: {}]   ;;  %s1693_s2 = inlined_call_operand.vmem [shape: f32[1,128], index: 2, kind: input, shape index: {}]   ;;  %s1694_s3 = inlined_call_operand.vmem [shape: bf16[128,8], index: 3, kind: input, shape index: {}]   ;;  %s1695_s4 = inlined_call_operand.vmem [shape: f32[1,8], index: 4, kind: input, shape index: {}]   ;;  %s1696_s5 = inlined_call_operand.vmem [shape: f32[8,128], index: 5, kind: input, shape index: {}]   ;;  %s1697_s6 = inlined_call_operand.vmem [shape: f32[8,128], index: 6, kind: input, shape index: {}]   ;;  %s1698_s7 = inlined_call_operand.vmem [shape: f32[1,128], index: 7, kind: input, shape index: {}]   ;;  %s1699_s8 = inlined_call_operand.vmem [shape: f32[128,128], index: 8, kind: input, shape index: {}]   ;;  %s1700_s9 = inlined_call_operand.vmem [shape: f32[8,128], index: 9, kind: output, shape index: {}]  }
   0x1   :  { %s22_s10 = sshll.u32 %s1484_s30, 4  ;;  %s23_s10 = int_to_ptr.vmem [resolvable:$true] %s22_s10 }
   0x2   :  { %s1470_s11 = scalar_lea.vmem %s23_s10, 8192  ;;  %p1475_p1 = scmp.lt.s32.totalorder %s23_s10, %s23_s10 }
   0x3   :  { %p1471_p0 = scmp.ne.s32.totalorder %s23_s10, %s1470_s11  ;;  %p1476_p2 = scmp.lt.s32.totalorder %s1470_s11, %s1470_s11 }
   0x5   :  { %p1477_p3 = por %p1476_p2, %p1475_p1 }
   0x7   :  { %p1478_p4 = pnand %p1477_p3, %p1471_p0 }
   0x9   :  { %1481 = shalt.err (!%p1478_p4)
}
   0xa   :  { %s1485_s12 = smov 64   ;;  %s1486_s13 = smov 4  }
   0xb   :  { %28 = dma.hbm_to_vmem [thread:$0]  %s1692_s1, 8192, %s23_s10, [#allocation3], %s1485_s12, %s1485_s12, %s1486_s13  }
   0xc   :  { %1482 = dma.done.wait [#allocation3], 8192  }
   0xd   :  { %1483 = vsyncadd [#allocation3], 4294959104  ;;  %v1386_v0 = vld [vmem:[#allocation2 + $0x78] sm:$0xff]   ;;  %v1390_v4 = vld [vmem:[#allocation2 + $0x70] sm:$0xff]   ;;  %vm1488_vm0 = vmmov 0   ;;  %vm858_vm1 = vcmask 64512  }
   0xe   :  { %v1387_v1 = vld [vmem:[#allocation2 + $0xf8] sm:$0xff]   ;;  %1196 = vmatprep.subr.bf16.mxu0 %v1386_v0  ;;  %v1391_v5 = vld [vmem:[#allocation2 + $0xf0] sm:$0xff]   ;;  %v1394_v8 = vld [vmem:[#allocation2 + $0x68] sm:$0xff]  }
   0xf   :  { %v1388_v2 = vld [vmem:[#allocation2 + $0x38] sm:$0xff]   ;;  %1218 = vmatprep.subr.bf16.mxu1 %v1387_v1  ;;  %v1392_v6 = vld [vmem:[#allocation2 + $0x30] sm:$0xff]   ;;  %v1395_v9 = vld [vmem:[#allocation2 + $0xe8] sm:$0xff]  }
  0x10   :  { %v1389_v3 = vld [vmem:[#allocation2 + $0xb8] sm:$0xff]   ;;  %1197 = vmatpush3.bf16.msra.mxu0 %v1388_v2  ;;  %v1393_v7 = vld [vmem:[#allocation2 + $0xb0] sm:$0xff]   ;;  %v1396_v10 = vld [vmem:[#allocation2 + $0x28] sm:$0xff]  }
  0x11   :  { %1219 = vmatpush3.bf16.msra.mxu1 %v1389_v3  ;;  %1198 = vmatprep.subr.bf16.mxu0 %v1390_v4  ;;  %v1397_v11 = vld [vmem:[#allocation2 + $0xa8] sm:$0xff]   ;;  %v1398_v12 = vld [vmem:[#allocation2 + $0x60] sm:$0xff]   ;;  %v1402_v16 = vld [vmem:[#allocation2 + $0x58] sm:$0xff]  }
  0x12   :  { %1220 = vmatprep.subr.bf16.mxu1 %v1391_v5  ;;  %v1399_v13 = vld [vmem:[#allocation2 + $0xe0] sm:$0xff]   ;;  %v1403_v17 = vld [vmem:[#allocation2 + $0xd8] sm:$0xff]   ;;  %v1406_v20 = vld [vmem:[#allocation2 + $0x50] sm:$0xff]  }
  0x13   :  { %v1400_v14 = vld [vmem:[#allocation2 + $0x20] sm:$0xff]   ;;  %v1404_v18 = vld [vmem:[#allocation2 + $0x18] sm:$0xff]   ;;  %v1407_v21 = vld [vmem:[#allocation2 + $0xd0] sm:$0xff]  }
  0x14   :  { %1199 = vmatpush3.bf16.msra.mxu0 %v1392_v6  ;;  %v1401_v15 = vld [vmem:[#allocation2 + $0xa0] sm:$0xff]   ;;  %v1405_v19 = vld [vmem:[#allocation2 + $0x98] sm:$0xff]   ;;  %v1408_v22 = vld [vmem:[#allocation2 + $0x10] sm:$0xff]  }
  0x15   :  { %1221 = vmatpush3.bf16.msra.mxu1 %v1393_v7  ;;  %1200 = vmatprep.subr.bf16.mxu0 %v1394_v8  ;;  %v1409_v23 = vld [vmem:[#allocation2 + $0x90] sm:$0xff]   ;;  %v1410_v24 = vld [vmem:[#allocation2 + $0x48] sm:$0xff]   ;;  %v1414_v28 = vld [vmem:[#allocation2 + $0x40] sm:$0xff]  }
  0x16   :  { %1222 = vmatprep.subr.bf16.mxu1 %v1395_v9  ;;  %v1411_v25 = vld [vmem:[#allocation2 + $0xc8] sm:$0xff]   ;;  %v1415_v29 = vld [vmem:[#allocation2 + $0xc0] sm:$0xff]   ;;  %v50_v33 = vld [vmem:[%s1691_s0 + $0x18] sm:$0xff] }
  0x17   :  { %v1412_v26 = vld [vmem:[#allocation2 + $0x8] sm:$0xff]   ;;  %v1416_v30 = vld [vmem:[#allocation2] sm:$0xff]   ;;  %v58_v36 = vpack.c.bf16 %v50_v33, %v50_v33  ;;  %v49_v38 = vld [vmem:[%s1691_s0 + $0x10] sm:$0xff] }
  0x18   :  { %1201 = vmatpush3.bf16.msra.mxu0 %v1396_v10  ;;  %v1413_v27 = vld [vmem:[#allocation2 + $0x88] sm:$0xff]   ;;  %v1417_v31 = vld [vmem:[#allocation2 + $0x80] sm:$0xff]   ;;  %v57_v39 = vpack.c.bf16 %v49_v38, %v49_v38  ;;  %v1418_v40 = vld [vmem:[#allocation2 + $0x178] sm:$0xff]  }
  0x19   :  { %1223 = vmatpush3.bf16.msra.mxu1 %v1397_v11  ;;  %1202 = vmatprep.subr.bf16.mxu0 %v1398_v12  ;;  %v48_v32 = vld [vmem:[%s1691_s0 + $0x8] sm:$0xff]  ;;  %v47_v34 = vld [vmem:[%s1691_s0] sm:$0xff]  ;;  %v1419_v41 = vld [vmem:[#allocation2 + $0x1f8] sm:$0xff]  }
  0x1a   :  { %1224 = vmatprep.subr.bf16.mxu1 %v1399_v13  ;;  %v56_v35 = vpack.c.bf16 %v48_v32, %v48_v32  ;;  %v55_v37 = vpack.c.bf16 %v47_v34, %v47_v34  ;;  %654 = vmatprep.mubr.bf16.mxu1 %v58_v36  ;;  %v1420_v42 = vld [vmem:[#allocation2 + $0x138] sm:$0xff]   ;;  %v1422_v44 = vld [vmem:[#allocation2 + $0x170] sm:$0xff]   ;;  %v1426_v48 = vld [vmem:[#allocation2 + $0x168] sm:$0xff]  }
  0x1b   :  { %v1421_v43 = vld [vmem:[#allocation2 + $0x1b8] sm:$0xff]   ;;  %v1423_v45 = vld [vmem:[#allocation2 + $0x1f0] sm:$0xff]   ;;  %v1427_v49 = vld [vmem:[#allocation2 + $0x1e8] sm:$0xff]  }
  0x1c   :  { %1203 = vmatpush3.bf16.msra.mxu0 %v1400_v14  ;;  %614 = vmatprep.mubr.bf16.mxu0 %v56_v35  ;;  %v1424_v46 = vld [vmem:[#allocation2 + $0x130] sm:$0xff]   ;;  %v1428_v50 = vld [vmem:[#allocation2 + $0x128] sm:$0xff]   ;;  %v1430_v52 = vld [vmem:[#allocation2 + $0x160] sm:$0xff]  }
  0x1d   :  { %1225 = vmatpush3.bf16.msra.mxu1 %v1401_v15  ;;  %1204 = vmatprep.subr.bf16.mxu0 %v1402_v16  ;;  %v1425_v47 = vld [vmem:[#allocation2 + $0x1b0] sm:$0xff]   ;;  %v1429_v51 = vld [vmem:[#allocation2 + $0x1a8] sm:$0xff]   ;;  %v1431_v53 = vld [vmem:[#allocation2 + $0x1e0] sm:$0xff]  }
  0x1e   :  { %1226 = vmatprep.subr.bf16.mxu1 %v1403_v17  ;;  %v1432_v54 = vld [vmem:[#allocation2 + $0x120] sm:$0xff]   ;;  %v1434_v56 = vld [vmem:[#allocation2 + $0x158] sm:$0xff]   ;;  %v1438_v60 = vld [vmem:[#allocation2 + $0x150] sm:$0xff]   ;;  %v1487_v17 = vmov 0.0  }
  0x1f   :  { %v1433_v55 = vld [vmem:[#allocation2 + $0x1a0] sm:$0xff]   ;;  %v1435_v57 = vld [vmem:[#allocation2 + $0x1d8] sm:$0xff]   ;;  %v1439_v61 = vld [vmem:[#allocation2 + $0x1d0] sm:$0xff]  }
  0x20   :  { %1205 = vmatpush3.bf16.msra.mxu0 %v1404_v18  ;;  %v1436_v58 = vld [vmem:[#allocation2 + $0x118] sm:$0xff]   ;;  %v1440_v62 = vld [vmem:[#allocation2 + $0x110] sm:$0xff]   ;;  %v1442_v0 = vld [vmem:[#allocation2 + $0x148] sm:$0xff]  }
  0x21   :  { %1227 = vmatpush3.bf16.msra.mxu1 %v1405_v19  ;;  %1206 = vmatprep.subr.bf16.mxu0 %v1406_v20  ;;  %v1437_v59 = vld [vmem:[#allocation2 + $0x198] sm:$0xff]   ;;  %v1441_v63 = vld [vmem:[#allocation2 + $0x190] sm:$0xff]   ;;  %v1443_v1 = vld [vmem:[#allocation2 + $0x1c8] sm:$0xff]  }
  0x22   :  { %1228 = vmatprep.subr.bf16.mxu1 %v1407_v21  ;;  %v1444_v2 = vld [vmem:[#allocation2 + $0x108] sm:$0xff]   ;;  %v1446_v4 = vld [vmem:[#allocation2 + $0x140] sm:$0xff]   ;;  %v54_v9 = vld [vmem:[%s1691_s0 + $0x38] sm:$0xff] }
  0x23   :  { %v1445_v3 = vld [vmem:[#allocation2 + $0x188] sm:$0xff]   ;;  %v1447_v5 = vld [vmem:[#allocation2 + $0x1c0] sm:$0xff]   ;;  %v62_v11 = vpack.c.bf16 %v54_v9, %v54_v9  ;;  %v53_v13 = vld [vmem:[%s1691_s0 + $0x30] sm:$0xff] }
  0x24   :  { %1207 = vmatpush3.bf16.msra.mxu0 %v1408_v22  ;;  %v1448_v6 = vld [vmem:[#allocation2 + $0x100] sm:$0xff]   ;;  %v52_v8 = vld [vmem:[%s1691_s0 + $0x28] sm:$0xff]  ;;  %v61_v15 = vpack.c.bf16 %v53_v13, %v53_v13  ;;  %v1450_v16 = vld [vmem:[%s1694_s3 + $0x38] sm:$0xff]  }
  0x25   :  { %1229 = vmatpush3.bf16.msra.mxu1 %v1409_v23  ;;  %1208 = vmatprep.subr.bf16.mxu0 %v1410_v24  ;;  %v1449_v7 = vld [vmem:[#allocation2 + $0x180] sm:$0xff]   ;;  %v60_v10 = vpack.c.bf16 %v52_v8, %v52_v8  ;;  %v1451_v18 = vld [vmem:[%s1694_s3 + $0x30] sm:$0xff]   ;;  %v1452_v19 = vld [vmem:[%s1694_s3 + $0x28] sm:$0xff]  }
  0x26   :  { %1230 = vmatprep.subr.bf16.mxu1 %v1411_v25  ;;  %v51_v12 = vld [vmem:[%s1691_s0 + $0x20] sm:$0xff]  ;;  %v1454_v21 = vld [vmem:[%s1694_s3 + $0x18] sm:$0xff]   ;;  %v1455_v22 = vld [vmem:[%s1694_s3 + $0x10] sm:$0xff]  }
  0x27   :  { %v59_v14 = vpack.c.bf16 %v51_v12, %v51_v12  ;;  %v1453_v20 = vld [vmem:[%s1694_s3 + $0x20] sm:$0xff]   ;;  %v1456_v23 = vld [vmem:[%s1694_s3 + $0x8] sm:$0xff]   ;;  %v1026_v12 = vld [vmem:[%s1699_s8 + $0x38] sm:$0xff] }
  0x28   :  { %1209 = vmatpush3.bf16.msra.mxu0 %v1412_v26  ;;  %v1457_v24 = vld [vmem:[%s1694_s3] sm:$0xff]   ;;  %v1025_v13 = vld [vmem:[%s1699_s8 + $0x30] sm:$0xff] }
  0x29   :  { %1231 = vmatpush3.bf16.msra.mxu1 %v1413_v27  ;;  %1210 = vmatprep.subr.bf16.mxu0 %v1414_v28  ;;  %v856_v25 = vld [vmem:[%s1696_s5] sm:$0xff] }
  0x2a   :  { %1232 = vmatprep.subr.bf16.mxu1 %v1415_v29  ;;  %v1119_v35 = vld [vmem:[%s1693_s2] ss:$0 sm:$0xff] }
  0x2c   :  { %1211 = vmatpush3.bf16.msra.mxu0 %v1416_v30 }
  0x2d   :  { %1233 = vmatpush3.bf16.msra.mxu1 %v1417_v31  ;;  %1240 = vmatprep.subr.bf16.mxu0 %v1418_v40 }
  0x2e   :  { %1262 = vmatprep.subr.bf16.mxu1 %v1419_v41 }
  0x2f   :  { %615 = vmatmul.mubr.bf16.vlgmr.msra.gmra.mxu0 %v55_v37 }
  0x30   :  { %655 = vmatmul.mubr.bf16.vlgmr.msra.gmra.mxu1 %v57_v39  ;;  %1241 = vmatpush3.bf16.msra.mxu0 %v1420_v42 }
  0x31   :  { %1263 = vmatpush3.bf16.msra.mxu1 %v1421_v43  ;;  %1242 = vmatprep.subr.bf16.mxu0 %v1422_v44 }
  0x32   :  { %1264 = vmatprep.subr.bf16.mxu1 %v1423_v45  ;;  %694 = vmatprep.mubr.bf16.mxu0 %v60_v10  ;;  %v1028_v10 = vld [vmem:[%s1699_s8 + $0x48] sm:$0xff] }
  0x33   :  { %734 = vmatprep.mubr.bf16.mxu1 %v62_v11  ;;  %v1027_v11 = vld [vmem:[%s1699_s8 + $0x40] sm:$0xff] }
  0x34   :  { %1243 = vmatpush3.bf16.msra.mxu0 %v1424_v46 }
  0x35   :  { %1265 = vmatpush3.bf16.msra.mxu1 %v1425_v47  ;;  %1244 = vmatprep.subr.bf16.mxu0 %v1426_v48 }
  0x36   :  { %1266 = vmatprep.subr.bf16.mxu1 %v1427_v49 }
  0x38   :  { %1245 = vmatpush3.bf16.msra.mxu0 %v1428_v50 }
  0x39   :  { %1267 = vmatpush3.bf16.msra.mxu1 %v1429_v51  ;;  %1246 = vmatprep.subr.bf16.mxu0 %v1430_v52 }
  0x3a   :  { %1268 = vmatprep.subr.bf16.mxu1 %v1431_v53  ;;  %v857_v53 = vld [vmem:[%s1697_s6] sm:$0xff] }
  0x3c   :  { %1247 = vmatpush3.bf16.msra.mxu0 %v1432_v54  ;;  %v1184_v54 = vld [vmem:[%s1695_s4] ss:$0 sm:$0xff] }
  0x3d   :  { %1269 = vmatpush3.bf16.msra.mxu1 %v1433_v55  ;;  %1248 = vmatprep.subr.bf16.mxu0 %v1434_v56 }
  0x3e   :  { %1270 = vmatprep.subr.bf16.mxu1 %v1435_v57 }
  0x40   :  { %1249 = vmatpush3.bf16.msra.mxu0 %v1436_v58 }
  0x41   :  { %1271 = vmatpush3.bf16.msra.mxu1 %v1437_v59  ;;  %1250 = vmatprep.subr.bf16.mxu0 %v1438_v60 }
  0x42   :  { %1272 = vmatprep.subr.bf16.mxu1 %v1439_v61  ;;  %v1034_v61 = vld [vmem:[%s1699_s8 + $0x78] sm:$0xff] }
  0x44   :  { %1251 = vmatpush3.bf16.msra.mxu0 %v1440_v62  ;;  %v1033_v62 = vld [vmem:[%s1699_s8 + $0x70] sm:$0xff] }
  0x45   :  { %1273 = vmatpush3.bf16.msra.mxu1 %v1441_v63  ;;  %1252 = vmatprep.subr.bf16.mxu0 %v1442_v0  ;;  %v1032_v63 = vld [vmem:[%s1699_s8 + $0x68] sm:$0xff]  ;;  %v1031_v0 = vld [vmem:[%s1699_s8 + $0x60] sm:$0xff] }
  0x46   :  { %1274 = vmatprep.subr.bf16.mxu1 %v1443_v1  ;;  %v1030_v1 = vld [vmem:[%s1699_s8 + $0x58] sm:$0xff] }
  0x48   :  { %1253 = vmatpush3.bf16.msra.mxu0 %v1444_v2  ;;  %v1029_v2 = vld [vmem:[%s1699_s8 + $0x50] sm:$0xff] }
  0x49   :  { %1275 = vmatpush3.bf16.msra.mxu1 %v1445_v3  ;;  %1254 = vmatprep.subr.bf16.mxu0 %v1446_v4 }
  0x4a   :  { %1276 = vmatprep.subr.bf16.mxu1 %v1447_v5 }
  0x4c   :  { %1255 = vmatpush3.bf16.msra.mxu0 %v1448_v6  ;;  %v1195_v6 = vld [vmem:[%s1698_s7] ss:$0 sm:$0xff] }
  0x4d   :  { %1277 = vmatpush3.bf16.msra.mxu1 %v1449_v7  ;;  %1314 = vmatprep.subr.bf16.mxu0 %v1487_v17 }
  0x4e   :  { %1339 = vmatprep.subr.mxu1 %v1487_v17 }
  0x4f   :  { %695 = vmatmul.mubr.bf16.vlgmr.msra.gmra.mxu0 %v59_v14  ;;  %v1024_v14 = vld [vmem:[%s1699_s8 + $0x28] sm:$0xff] }
  0x50   :  { %735 = vmatmul.mubr.bf16.vlgmr.msra.gmra.mxu1 %v61_v15  ;;  %1315 = vmatpush3.bf16.msra.mxu0 %v1450_v16  ;;  %v1023_v15 = vld [vmem:[%s1699_s8 + $0x20] sm:$0xff]  ;;  %v1022_v16 = vld [vmem:[%s1699_s8 + $0x18] sm:$0xff] }
  0x51   :  { %1316 = vmatprep.subr.bf16.mxu0 %v1487_v17  ;;  %1330 = vmatprep.mubr.msk.bf16.mxu0 %vm1488_vm0, %v1487_v17 }
  0x52   :  { %1341 = vmatprep.mubr.msk.f32.mxu1 %vm1488_vm0, %v1487_v17  ;;  %1340 = vmatpush3.msra.mxu1 %v856_v25 }
  0x53   :  { %1344 = vmatprep.subr.mxu1 %v1487_v17 }
  0x54   :  { %1317 = vmatpush3.bf16.msra.mxu0 %v1451_v18  ;;  %v1021_v18 = vld [vmem:[%s1699_s8 + $0x10] sm:$0xff] }
  0x55   :  { %1318 = vmatprep.subr.bf16.mxu0 %v1487_v17 }
  0x58   :  { %1319 = vmatpush3.bf16.msra.mxu0 %v1452_v19  ;;  %v1020_v19 = vld [vmem:[%s1699_s8 + $0x8] sm:$0xff] }
  0x59   :  { %1320 = vmatprep.subr.bf16.mxu0 %v1487_v17 }
  0x5c   :  { %1321 = vmatpush3.bf16.msra.mxu0 %v1453_v20  ;;  %v1019_v20 = vld [vmem:[%s1699_s8] sm:$0xff] }
  0x5d   :  { %1322 = vmatprep.subr.bf16.mxu0 %v1487_v17 }
  0x60   :  { %1323 = vmatpush3.bf16.msra.mxu0 %v1454_v21 }
  0x61   :  { %1324 = vmatprep.subr.bf16.mxu0 %v1487_v17 }
  0x64   :  { %1325 = vmatpush3.bf16.msra.mxu0 %v1455_v22 }
  0x65   :  { %1326 = vmatprep.subr.bf16.mxu0 %v1487_v17 }
  0x68   :  { %1327 = vmatpush3.bf16.msra.mxu0 %v1456_v23 }
  0x69   :  { %1328 = vmatprep.subr.bf16.mxu0 %v1487_v17 }
  0x6c   :  { %1329 = vmatpush3.bf16.msra.mxu0 %v1457_v24 }
  0x6d   :  { %1334 = vmatprep.subr.mxu0 %v1487_v17 }
  0xef   :  { %v1212_v26 = vpop.f32.mrf.mxu0 }
  0xf0   :  { %v1234_v27 = vpop.f32.mrf.mxu1 }
  0xf1   :  { %v1213_v28 = vpop.f32.mrf.mxu0 }
  0xf2   :  { %v1235_v29 = vpop.f32.mrf.mxu1  ;;  %v1214_v34 = vadd.f32 %v1213_v28, %v1212_v26  ;;  %v1489_v26 = vmov 0  }
  0xf3   :  { %v1215_v30 = vpop.f32.mrf.mxu0  ;;  %v1236_v37 = vadd.f32 %v1235_v29, %v1234_v27  ;;  %1385 = vset.pattern.permute.xlu0 %v1489_v26 }
  0xf4   :  { %v1237_v31 = vpop.f32.mrf.mxu1  ;;  %v617_v36 = vadd.f32 %v1214_v34, %v1119_v35 }
  0xf5   :  { %v1216_v32 = vpop.f32.mrf.mxu0 }
  0xf6   :  { %v1238_v33 = vpop.f32.mrf.mxu1  ;;  %v657_v41 = vadd.f32 %v1236_v37, %v617_v36 }
 0x10f   :  { %v1256_v38 = vpop.f32.mrf.mxu0 }
 0x110   :  { %v1278_v39 = vpop.f32.mrf.mxu1 }
 0x111   :  { %v1257_v40 = vpop.f32.mrf.mxu0 }
 0x112   :  { %v1258_v42 = vadd.f32 %v1257_v40, %v1256_v38  ;;  %v1279_v43 = vpop.f32.mrf.mxu1 }
 0x113   :  { %v1259_v44 = vpop.f32.mrf.mxu0  ;;  %v1280_v46 = vadd.f32 %v1279_v43, %v1278_v39 }
 0x114   :  { %v697_v45 = vadd.f32 %v1258_v42, %v657_v41  ;;  %v1281_v47 = vpop.f32.mrf.mxu1 }
 0x115   :  { %v1260_v48 = vpop.f32.mrf.mxu0 }
 0x116   :  { %v737_v49 = vadd.f32 %v1280_v46, %v697_v45  ;;  %v1282_v50 = vpop.f32.mrf.mxu1 }
 0x118   :  { %v742_v51 = vmax.f32 %v737_v49, 0.0 }
 0x11a   :  { %v743_v52 = vpack.c.bf16 %v742_v51, %v742_v51 }
 0x11c   :  { %1331 = vmatmul.mubr.bf16.vlgmr.msra.gmra.mxu0 %v743_v52 }
 0x11d   :  { %1335 = vmatpush3.msra.mxu0 %v857_v53  ;;  %1336 = vmatprep.mubr.msk.f32.mxu0 %vm1488_vm0, %v1487_v17 }
 0x1dc   :  { %v849_v55 = vpop.f32.mrf.mxu0 }
 0x1dd   :  { %v850_v56 = vadd.f32 %v1184_v54, %v849_v55 }
 0x1de   :  { %v1332_v57 = vpop.f32.mrf.mxu0 }
 0x1df   :  { %v855_v58 = vmul.f32 %v850_v56, %v850_v56  ;;  %1337 = vmatmul.mubr.msk.f32.vlgmr.msra.gmra.mxu0 %vm858_vm1, %v850_v56 }
 0x1e0   :  { %v852_v59 = vpop.f32.mrf.mxu0 }
 0x1e1   :  { %1342 = vmatmul.mubr.msk.f32.vlgmr.msra.gmra.mxu1 %vm858_vm1, %v855_v58 }
 0x1e2   :  { %v1333_v60 = vpop.f32.mrf.mxu0  ;;  %1376 = vmatprep.mubr.msk.f32.mxu1 %vm1488_vm0, %v1487_v17  ;;  %1345 = vmatpush3.msra.mxu1 %v1034_v61 }
 0x1e3   :  { %1346 = vmatprep.subr.mxu1 %v1487_v17 }
 0x1e4   :  { %1347 = vmatpush3.msra.mxu1 %v1033_v62 }
 0x1e5   :  { %1348 = vmatprep.subr.mxu1 %v1487_v17 }
 0x1e6   :  { %1349 = vmatpush3.msra.mxu1 %v1032_v63 }
 0x1e7   :  { %1350 = vmatprep.subr.mxu1 %v1487_v17 }
 0x1e8   :  { %1351 = vmatpush3.msra.mxu1 %v1031_v0 }
 0x1e9   :  { %1352 = vmatprep.subr.mxu1 %v1487_v17 }
 0x1ea   :  { %1353 = vmatpush3.msra.mxu1 %v1030_v1 }
 0x1eb   :  { %1354 = vmatprep.subr.mxu1 %v1487_v17 }
 0x1ec   :  { %1355 = vmatpush3.msra.mxu1 %v1029_v2 }
 0x1ed   :  { %1356 = vmatprep.subr.mxu1 %v1487_v17 }
 0x1ee   :  { %1357 = vmatpush3.msra.mxu1 %v1028_v10 }
 0x1ef   :  { %1358 = vmatprep.subr.mxu1 %v1487_v17 }
 0x1f0   :  { %1359 = vmatpush3.msra.mxu1 %v1027_v11 }
 0x1f1   :  { %1360 = vmatprep.subr.mxu1 %v1487_v17 }
 0x1f2   :  { %1361 = vmatpush3.msra.mxu1 %v1026_v12 }
 0x1f3   :  { %1362 = vmatprep.subr.mxu1 %v1487_v17 }
 0x1f4   :  { %1363 = vmatpush3.msra.mxu1 %v1025_v13 }
 0x1f5   :  { %1364 = vmatprep.subr.mxu1 %v1487_v17 }
 0x1f6   :  { %1365 = vmatpush3.msra.mxu1 %v1024_v14 }
 0x1f7   :  { %1366 = vmatprep.subr.mxu1 %v1487_v17 }
 0x1f8   :  { %1367 = vmatpush3.msra.mxu1 %v1023_v15 }
 0x1f9   :  { %1368 = vmatprep.subr.mxu1 %v1487_v17 }
 0x1fa   :  { %1369 = vmatpush3.msra.mxu1 %v1022_v16 }
 0x1fb   :  { %1370 = vmatprep.subr.mxu1 %v1487_v17 }
 0x1fc   :  { %1371 = vmatpush3.msra.mxu1 %v1021_v18 }
 0x1fd   :  { %1372 = vmatprep.subr.mxu1 %v1487_v17 }
 0x1fe   :  { %1373 = vmatpush3.msra.mxu1 %v1020_v19 }
 0x1ff   :  { %1374 = vmatprep.subr.mxu1 %v1487_v17 }
 0x200   :  { %1375 = vmatpush3.msra.mxu1 %v1019_v20 }
 0x29f   :  { %v928_v3 = vpop.f32.mrf.mxu0 }
 0x2a1   :  { %v1338_v4 = vpop.f32.mrf.mxu0  ;;  %v1001_v5 = vpop.f32.mrf.mxu1 }
 0x2a2   :  { %v1002_v7 = vadd.f32 %v1001_v5, %v928_v3 }
 0x2a3   :  { %v1343_v8 = vpop.f32.mrf.mxu1 }
 0x2a4   :  { %v1012_v9 = vadd.f32 %v1195_v6, %v1002_v7 }
 0x2a6   :  { %1013 = vmin.xlane.f32.xlu0 %v1012_v9 }
 0x32f   :  { %v1014_v21 = vpop.xlane.xlu0 %1013 }
 0x330   :  { %v1015_v22 = vsub.f32 %v1012_v9, %v1014_v21 }
 0x332   :  { %v1016_v23 = vsub.f32 0.0, %v1015_v22 }
 0x334   :  { %v1017_v24 = vmul.f32 1.442695, %v1016_v23 }
 0x336   :  { %1458 = vpow2.f32 %v1017_v24 }
 0x343   :  { %v1459_v25 = vpop.eup %1458 }
 0x344   :  { %1377 = vmatmul.mubr.f32.vlgmr.msra.gmra.mxu1 %v1459_v25 }
 0x404   :  { %v1101_v27 = vpop.f32.mrf.mxu1 }
 0x405   :  { %v1105_v28 = vadd.f32 1e-12, %v1101_v27 }
 0x406   :  { %v1378_v29 = vpop.f32.mrf.mxu1 }
 0x407   :  { %1460 = vrcp.f32 %v1105_v28 }
 0x414   :  { %v1461_v30 = vpop.eup %1460 }
 0x415   :  { %1109 = vperm.xlu0 %1385, %v1461_v30  }
 0x490   :  { %v1110_v31 = vpop.permute.xlu0 %1109 }
 0x491   :  { %v1112_v32 = vmul.f32 %v1110_v31, %v1101_v27 }
 0x493   :  { %1113 = vst [vmem:[%s1700_s9] sm:$0xff] %v1112_v32 }
 0x494   :  { %1118 = vsyncpa [#allocation3], 1 }

</bundles_post_ra>
